<compile_context>
chip_gen: v6e
topology: v6e:2x2x1
jax: 0.10.0
libtpu: 0.0.40
codegen_flags: <defaults>
</compile_context>

<pallas_src>
import functools

import jax
import jax.numpy as jnp
from jax.experimental import pallas as pl
from jax.experimental.pallas import tpu as pltpu


def _label_smoothing_kernel(pred_ref, tgt_ref, out_ref, acc_ref, *,
                            smoothing, total_rows, tile_b):
    i = pl.program_id(0)

    @pl.when(i == 0)
    def _init():
        acc_ref[...] = jnp.zeros_like(acc_ref)

    pred = pred_ref[...]                       # (tile_b, C), native dtype
    tgt = tgt_ref[...]                         # (tile_b, 1) int32
    tb, n_classes = pred.shape

    # Numerically stable log-sum-exp per row; keep elementwise work in the
    # input dtype (bf16 VPU/EUP on v6e/v7x), accumulate reductions in f32.
    m = jnp.max(pred, axis=1, keepdims=True)                       # (tb, 1)
    z = pred - m                                                   # (tb, C)
    lse = jnp.log(jnp.sum(jnp.exp(z), axis=1, keepdims=True,
                          dtype=jnp.float32))                      # (tb, 1) f32
    sum_z = jnp.sum(z, axis=1, keepdims=True, dtype=jnp.float32)   # (tb, 1) f32

    # z at the target class via a masked row reduce (no one_hot materialized).
    col = jax.lax.broadcasted_iota(jnp.int32, (tb, n_classes), 1)
    z_tgt = jnp.sum(jnp.where(col == tgt, z, jnp.zeros_like(z)),
                    axis=1, keepdims=True, dtype=jnp.float32)      # (tb, 1) f32

    # loss_row = -(1-s)*(z_tgt - lse) - (s/C)*(sum_z - C*lse)
    c1 = jnp.float32(1.0 - smoothing)
    c2 = jnp.float32(smoothing)
    c3 = jnp.float32(smoothing / n_classes)
    row_loss = c1 * (lse - z_tgt) + c2 * lse - c3 * sum_z          # (tb, 1) f32

    # Mask rows of the last (ragged) tile that fall beyond the real batch.
    row_ids = i * tile_b + jax.lax.broadcasted_iota(jnp.int32, (tb, 1), 0)
    row_loss = jnp.where(row_ids < total_rows, row_loss, jnp.float32(0.0))

    acc_ref[...] += jnp.sum(row_loss, axis=0, keepdims=True)       # (1, 1)
    # Mean over the batch: multiply by the compile-time constant 1/B.
    out_ref[...] = acc_ref[...] * jnp.float32(1.0 / total_rows)


def _choose_tile_b(B, C, itemsize, vmem_budget_bytes):
    # Double-buffered pred block: 2 * tile_b * C * itemsize must fit the budget.
    cand = vmem_budget_bytes // max(1, 2 * C * itemsize)
    cand = max(8, min(1024, (cand // 8) * 8))   # multiple of 8 (sublane rule)
    return B if B <= cand else cand             # full-B block is always legal


def label_smoothing_loss(pred, target, smoothing=0.1, tile_b=None,
                         vmem_budget_bytes=16 * 1024 * 1024):
    """pred: (B, C) float, target: (B,) int. Returns scalar float32 loss."""
    B, C = pred.shape
    tgt2d = target.astype(jnp.int32).reshape(B, 1)

    if tile_b is None:
        tile_b = _choose_tile_b(B, C, jnp.dtype(pred.dtype).itemsize,
                                vmem_budget_bytes)
    # Block-shape rule: second-minor dim must be a multiple of 8 or the full B.
    assert tile_b == B or tile_b % 8 == 0, tile_b

    num_tiles = pl.cdiv(B, tile_b)

    kernel = functools.partial(
        _label_smoothing_kernel,
        smoothing=float(smoothing),
        total_rows=B,
        tile_b=tile_b,
    )

    out = pl.pallas_call(
        kernel,
        out_shape=jax.ShapeDtypeStruct((1, 1), jnp.float32),
        grid_spec=pltpu.PrefetchScalarGridSpec(
            num_scalar_prefetch=0,
            grid=(num_tiles,),
            in_specs=[
                pl.BlockSpec((tile_b, C), lambda i: (i, 0)),   # full class axis
                pl.BlockSpec((tile_b, 1), lambda i: (i, 0)),   # tiny target block
            ],
            out_specs=pl.BlockSpec((1, 1), lambda i: (0, 0)),  # carried scalar
            scratch_shapes=[pltpu.VMEM((1, 1), jnp.float32)],
        ),
        compiler_params=pltpu.CompilerParams(
            dimension_semantics=("arbitrary",),                # reduction axis
            vmem_limit_bytes=32 * 1024 * 1024,
        ),
    )(pred, tgt2d)
    return out[0, 0]


def label_smoothing_loss_ref(pred, target, smoothing=0.1):
    """Pure-JAX reference mirroring the PyTorch module."""
    n_classes = pred.shape[1]
    one_hot = jax.nn.one_hot(target, n_classes, dtype=jnp.float32)
    smooth_one_hot = one_hot * (1.0 - smoothing) + smoothing / n_classes
    log_prob = jax.nn.log_softmax(pred.astype(jnp.float32), axis=1)
    return jnp.mean(jnp.sum(-smooth_one_hot * log_prob, axis=1))


if __name__ == "__main__":
    key = jax.random.PRNGKey(0)
    k1, k2 = jax.random.split(key)

    # 20 rows x 16 classes; tile_b=8 -> 3 grid steps, last tile partially masked.
    B, C = 20, 16
    pred = jax.random.normal(k1, (B, C), dtype=jnp.float32)
    target = jax.random.randint(k2, (B,), 0, C, dtype=jnp.int32)

    loss = label_smoothing_loss(pred, target, smoothing=0.1, tile_b=8)
    loss = jax.block_until_ready(loss)

    ref = label_smoothing_loss_ref(pred, target, smoothing=0.1)
    assert jnp.allclose(loss, ref, atol=1e-5, rtol=1e-5), (loss, ref)

    print("KERNEL_OK")
</pallas_src>

<mosaic_0001>
module attributes {stable_mosaic.version = 11 : i64} {
  func.func @_label_smoothing_kernel(%arg0: i32, %arg1: memref<8x16xf32, #tpu.memory_space<vmem>>, %arg2: memref<8x1xi32, #tpu.memory_space<vmem>>, %arg3: memref<1x1xf32, #tpu.memory_space<vmem>>, %arg4: memref<1x1xf32, #tpu.memory_space<vmem>>) attributes {dimension_semantics = [#tpu.dimension_semantics<arbitrary>], iteration_bounds = array<i64: 3>, scalar_prefetch = 0 : i64, scratch_operands = 1 : i64, tpu.core_type = #tpu.core_type<tc>, window_params = [{transform_indices = @transform_0, window_bounds = array<i64: 8, 16>}, {transform_indices = @transform_1, window_bounds = array<i64: 8, 1>}, {pipeline_mode = #tpu.pipeline_mode<synchronous>, transform_indices = @transform_2, window_bounds = array<i64: 1, 1>}]} {
    %c0_i32 = arith.constant 0 : i32
    %0 = arith.cmpi eq, %arg0, %c0_i32 : i32
    %1 = arith.extui %0 : i1 to i32
    %c0_i32_0 = arith.constant 0 : i32
    %2 = arith.cmpi ne, %1, %c0_i32_0 : i32
    scf.if %2 {
      %cst_22 = arith.constant 0.000000e+00 : f32
      %48 = vector.broadcast %cst_22 : f32 to vector<1x1xf32>
      %c0_23 = arith.constant 0 : index
      %c0_24 = arith.constant 0 : index
      %49 = vector.load %arg4[%c0_23, %c0_24] : memref<1x1xf32, #tpu.memory_space<vmem>>, vector<1x1xf32>
      tpu.vector_store %arg4[%c0_23, %c0_24], %48 {strides = array<i32>} : memref<1x1xf32, #tpu.memory_space<vmem>>, vector<1x1xf32>,
    } else {
    }
    %c0 = arith.constant 0 : index
    %c0_1 = arith.constant 0 : index
    %3 = vector.load %arg1[%c0, %c0_1] : memref<8x16xf32, #tpu.memory_space<vmem>>, vector<8x16xf32>
    %c0_2 = arith.constant 0 : index
    %c0_3 = arith.constant 0 : index
    %4 = vector.load %arg2[%c0_2, %c0_3] : memref<8x1xi32, #tpu.memory_space<vmem>>, vector<8x1xi32>
    %cst = arith.constant dense<0xFF800000> : vector<8xf32>
    %5 = vector.multi_reduction <maximumf>, %3, %cst [1] : vector<8x16xf32> to vector<8xf32>
    %6 = vector.shape_cast %5 : vector<8xf32> to vector<8x1xf32>
    %7 = vector.broadcast %6 : vector<8x1xf32> to vector<8x16xf32>
    %8 = arith.subf %3, %7 : vector<8x16xf32>
    %9 = math.exp %8 : vector<8x16xf32>
    %cst_4 = arith.constant dense<0.000000e+00> : vector<8xf32>
    %10 = vector.multi_reduction <add>, %9, %cst_4 [1] : vector<8x16xf32> to vector<8xf32>
    %11 = vector.shape_cast %10 : vector<8xf32> to vector<8x1xf32>
    %12 = math.log %11 : vector<8x1xf32>
    %cst_5 = arith.constant dense<0.000000e+00> : vector<8xf32>
    %13 = vector.multi_reduction <add>, %8, %cst_5 [1] : vector<8x16xf32> to vector<8xf32>
    %14 = vector.shape_cast %13 : vector<8xf32> to vector<8x1xf32>
    %15 = tpu.iota {dimensions = array<i32: 1>} : vector<8x16xi32>
    %16 = vector.broadcast %4 : vector<8x1xi32> to vector<8x16xi32>
    %17 = arith.cmpi eq, %15, %16 : vector<8x16xi32>
    %cst_6 = arith.constant 0.000000e+00 : f32
    %18 = vector.broadcast %cst_6 : f32 to vector<8x16xf32>
    %19 = arith.select %17, %8, %18 : vector<8x16xi1>, vector<8x16xf32>
    %cst_7 = arith.constant dense<0.000000e+00> : vector<8xf32>
    %20 = vector.multi_reduction <add>, %19, %cst_7 [1] : vector<8x16xf32> to vector<8xf32>
    %21 = vector.shape_cast %20 : vector<8xf32> to vector<8x1xf32>
    %22 = arith.subf %12, %21 : vector<8x1xf32>
    %cst_8 = arith.constant 0.899999976 : f32
    %23 = vector.broadcast %cst_8 : f32 to vector<8x1xf32>
    %24 = arith.mulf %23, %22 : vector<8x1xf32>
    %cst_9 = arith.constant 1.000000e-01 : f32
    %25 = vector.broadcast %cst_9 : f32 to vector<8x1xf32>
    %26 = arith.mulf %25, %12 : vector<8x1xf32>
    %27 = arith.addf %24, %26 : vector<8x1xf32>
    %cst_10 = arith.constant 6.250000e-03 : f32
    %28 = vector.broadcast %cst_10 : f32 to vector<8x1xf32>
    %29 = arith.mulf %28, %14 : vector<8x1xf32>
    %30 = arith.subf %27, %29 : vector<8x1xf32>
    %c8_i32 = arith.constant 8 : i32
    %31 = arith.muli %arg0, %c8_i32 : i32
    %32 = tpu.iota {dimensions = array<i32: 0>} : vector<8x1xi32>
    %33 = vector.broadcast %31 : i32 to vector<8x1xi32>
    %34 = arith.addi %33, %32 : vector<8x1xi32>
    %c20_i32 = arith.constant 20 : i32
    %35 = vector.broadcast %c20_i32 : i32 to vector<8x1xi32>
    %36 = arith.cmpi slt, %34, %35 : vector<8x1xi32>
    %cst_11 = arith.constant 0.000000e+00 : f32
    %37 = vector.broadcast %cst_11 : f32 to vector<8x1xf32>
    %38 = arith.select %36, %30, %37 : vector<8x1xi1>, vector<8x1xf32>
    %c0_12 = arith.constant 0 : index
    %c0_13 = arith.constant 0 : index
    %39 = vector.load %arg4[%c0_12, %c0_13] : memref<1x1xf32, #tpu.memory_space<vmem>>, vector<1x1xf32>
    %cst_14 = arith.constant dense<0.000000e+00> : vector<1xf32>
    %40 = vector.multi_reduction <add>, %38, %cst_14 [0] : vector<8x1xf32> to vector<1xf32>
    %41 = vector.shape_cast %40 : vector<1xf32> to vector<1x1xf32>
    %42 = arith.addf %39, %41 : vector<1x1xf32>
    %c0_15 = arith.constant 0 : index
    %c0_16 = arith.constant 0 : index
    %43 = vector.load %arg4[%c0_15, %c0_16] : memref<1x1xf32, #tpu.memory_space<vmem>>, vector<1x1xf32>
    tpu.vector_store %arg4[%c0_15, %c0_16], %42 {strides = array<i32>} : memref<1x1xf32, #tpu.memory_space<vmem>>, vector<1x1xf32>,
    %c0_17 = arith.constant 0 : index
    %c0_18 = arith.constant 0 : index
    %44 = vector.load %arg4[%c0_17, %c0_18] : memref<1x1xf32, #tpu.memory_space<vmem>>, vector<1x1xf32>
    %cst_19 = arith.constant 5.000000e-02 : f32
    %45 = vector.broadcast %cst_19 : f32 to vector<1x1xf32>
    %46 = arith.mulf %44, %45 : vector<1x1xf32>
    %c0_20 = arith.constant 0 : index
    %c0_21 = arith.constant 0 : index
    %47 = vector.load %arg3[%c0_20, %c0_21] : memref<1x1xf32, #tpu.memory_space<vmem>>, vector<1x1xf32>
    tpu.vector_store %arg3[%c0_20, %c0_21], %46 {strides = array<i32>} : memref<1x1xf32, #tpu.memory_space<vmem>>, vector<1x1xf32>,
    return
  }
  func.func @transform_0(%arg0: i32) -> (i32, i32) {
    %c0_i32 = arith.constant 0 : i32
    %c0_i32_0 = arith.constant 0 : i32
    return %arg0, %c0_i32 : i32, i32
  }
  func.func @transform_1(%arg0: i32) -> (i32, i32) {
    %c0_i32 = arith.constant 0 : i32
    %c0_i32_0 = arith.constant 0 : i32
    return %arg0, %c0_i32 : i32, i32
  }
  func.func @transform_2(%arg0: i32) -> (i32, i32) {
    %c0_i32 = arith.constant 0 : i32
    %c0_i32_0 = arith.constant 0 : i32
    %c0_i32_1 = arith.constant 0 : i32
    return %c0_i32, %c0_i32_0 : i32, i32
  }
}

</mosaic_0001>

<bundles_post_ra>
// kernel: tpu_custom_call.1
= control target key start
LH: loop header
LB: loop body
LE: loop exit
PB: predicated region body
PF: predicated region fallthrough
CT: control target
= control target key end

     0   :  { %7 = vsyncpa [#allocation4], 0  ;;  %s349_s9 = smov 0   ;;  %s388_s0 = inlined_call_operand.vmem [shape: f32[20,16], index: 0, kind: input, shape index: {}]   ;;  %s389_s1 = inlined_call_operand.vmem [shape: s32[20,1], index: 1, kind: input, shape index: {}]   ;;  %s390_s2 = inlined_call_operand.hbm [shape: f32[1,1], index: 2, kind: output, shape index: {}]  }
   0x1 LB: > { %s355_s10 = sadd.s32 4294967295, %s329_s9   ;;  %p264_p0 = scmp.ge.s32.totalorder %s329_s9, 1  ;;  %s329_s9 = sphi %s349_s9, %s13_s9  }
   0x2   : > { %p116_p1 = scmp.lt.s32.totalorder %s329_s9, 4 }
   0x4   : > { %p117_p2 = pnand %p264_p0, %p116_p1 }
   0x5   : > { %p136_p3 = scmp.lt.s32.totalorder (!%p117_p2), %s355_s10, 2  ;;  %p267_p4 = scmp.ne.s32.totalorder (!%p117_p2), %s355_s10, 0 }
   0x6   : > { %120 = sbr.rel (%p117_p2) target bundleno = 370 (0x172), region = 28 }
   0xb   : > { %s137_s11 = scalar_select %p136_p3, %s355_s10, 2 }
   0xc   : > { %147 = sbr.rel (%p267_p4) target bundleno = 19 (0x13), region = 32 }
   0xd   : > { %s265_s12 = sshll.u32 %s137_s11, 3 }
   0xe   : > { %s139_s15 = scalar_lea.vmem %s388_s0, %s265_s12  ;;  %s143_s18 = scalar_lea.vmem %s389_s1, %s265_s12 }
  0x11   : > { %vm148_vm0 = vcmask 0   ;;  %v331_v0 = vmov 0.0  }
  0x12   : > { %149 = vst.msk [vmem:[#allocation2] sm:$0x1] %vm148_vm0, %v331_v0 }
  0x13 PF: > { %v150_v1 = vld [vmem:[%s139_s15] sm:$0xff]  ;;  %vm152_vm1 = vcmask 130048   ;;  %v332_v3 = vmov 0   ;;  %v167_v8 = vlaneseq  ;;  %s268_s19 = sshll.u32 %s355_s10, 3  ;;  %vm198_vm4 = vcmask 0   ;;  %s333_s20 = smov [#allocation3]  }
  0x14   : > { %v153_v2 = vsel %vm152_vm1, %v150_v1, -inf  ;;  %290 = vset.pattern.permute.xlu0 %v332_v3  ;;  %v151_v4 = vld [vmem:[%s143_s18] sm:$0xff]  ;;  %v186_v21 = vstv %s268_s19  ;;  %s210_s21 = sshll.u32 %s333_s20, 4  ;;  %p277_p5 = scmp.eq.s32.totalorder %s355_s10, 2  ;;  %s211_s21 = int_to_ptr.vmem [resolvable:$true] %s210_s21 }
  0x15   : > { %154 = vmax.xlane.f32.xlu0 %v153_v2  ;;  %v168_v9 = vand.u32 127, %v167_v8  ;;  %v185_v19 = vshrl.u32 %v167_v8, 7  ;;  %s295_s22 = scalar_lea.vmem %s211_s21, 16  ;;  %s301_s23 = scalar_lea.vmem %s211_s21, 32 }
  0x16   : > { %p296_p6 = scmp.ne.s32.totalorder %s211_s21, %s295_s22  ;;  %p302_p9 = scmp.lt.s32.totalorder %s211_s21, %s211_s21 }
  0x17   : > { %v187_v23 = vadd.s32 %v186_v21, %v185_v19  ;;  %p303_p10 = scmp.lt.s32.totalorder %s301_s23, %s295_s22 }
  0x18   : > { %p297_p7 = pnand %p296_p6, %p277_p5 }
  0x19   : > { %vm188_vm3 = vcmp.lt.s32.totalorder %v187_v23, 20  ;;  %v190_v36 = vld [vmem:[#allocation2] sm:$0x1]  ;;  %p304_p11 = por %p303_p10, %p302_p9 }
  0x1a   : > { %p298_p8 = pneg %p297_p7 }
  0x1c   : > { %p305_p12 = pnand %p304_p11, %p298_p8 }
  0x2b   : > { %170 = vperm.xlu0 %290, %v151_v4  }
  0x9e   : > { %v155_v5 = vpop.xlane.xlu0 %154 }
  0x9f   : > { %v156_v6 = vsub.f32 %v150_v1, %v155_v5 }
  0xa1   : > { %v157_v7 = vmul.f32 1.442695, %v156_v6  ;;  %v164_v15 = vsel %vm152_vm1, %v156_v6, 0.0 }
  0xa3   : > { %291 = vpow2.f32 %v157_v7 }
  0xa6   : > { %v171_v10 = vpop.permute.xlu0 %170 }
  0xa7   : > { %vm172_vm2 = vcmp.eq.s32.totalorder %v168_v9, %v171_v10 }
  0xa8   : > { %v173_v13 = vsel %vm172_vm2, %v156_v6, 0.0 }
  0xa9   : > { %v174_v14 = vsel %vm152_vm1, %v173_v13, 0.0 }
  0xb0   : > { %v292_v11 = vpop.eup %291 }
  0xb1   : > { %v159_v12 = vsel %vm152_vm1, %v292_v11, 0.0 }
  0xb2   : > { %160 = vadd.xlane.f32.xlu1 %v159_v12 }
  0xb6   : > { %175 = vadd.xlane.f32.xlu1 %v174_v14 }
  0xba   : > { %165 = vadd.xlane.f32.xlu1 %v164_v15 }
 0x13b   : > { %v161_v16 = vpop.xlane.xlu1 %160 }
 0x13c   : > { %293 = vlog2.f32 %v161_v16 }
 0x13f   : > { %v176_v17 = vpop.xlane.xlu1 %175 }
 0x143   : > { %v166_v24 = vpop.xlane.xlu1 %165 }
 0x144   : > { %v181_v28 = vmul.f32 0.00625, %v166_v24 }
 0x149   : > { %v294_v18 = vpop.eup %293 }
 0x14a   : > { %v163_v20 = vmul.f32 0.6931472, %v294_v18 }
 0x14c   : > { %v177_v22 = vsub.f32 %v163_v20, %v176_v17  ;;  %v179_v25 = vmul.f32 0.1, %v163_v20 }
 0x14e   : > { %v178_v26 = vmul.f32 0.9, %v177_v22 }
 0x150   : > { %v180_v27 = vadd.f32 %v179_v25, %v178_v26 }
 0x152   : > { %v182_v29 = vsub.f32 %v180_v27, %v181_v28 }
 0x154   : > { %v189_v30 = vsel %vm188_vm3, %v182_v29, 0.0 }
 0x155   : > { %v191_v31 = vrot.slane %v189_v30, 4 }
 0x157   : > { %v192_v32 = vadd.f32 %v191_v31, %v189_v30 }
 0x159   : > { %v193_v33 = vrot.slane %v192_v32, 2 }
 0x15b   : > { %v194_v34 = vadd.f32 %v193_v33, %v192_v32 }
 0x15d   : > { %v195_v35 = vrot.slane %v194_v34, 1 }
 0x15f   : > { %v196_v37 = vadd.f32 %v195_v35, %v194_v34 }
 0x161   : > { %v197_v38 = vadd.f32 %v196_v37, %v190_v36 }
 0x163   : > { %199 = vst.msk [vmem:[#allocation2] sm:$0x1] %vm198_vm4, %v197_v38 }
 0x16a   : > { %v200_v39 = vld [vmem:[#allocation2] sm:$0x1] }
 0x16b   : > { %v201_v40 = vmul.f32 0.05, %v200_v39 }
 0x16d   : > { %202 = vst.msk [vmem:[#allocation3] sm:$0x1] %vm198_vm4, %v201_v40 }
 0x16e   : > { %308 = shalt.err (!%p305_p12)
}
 0x16f   : > { %274 = dma.vmem_to_hbm [thread:$0]  (%p277_p5), %s211_s21, 16, %s390_s2, [#allocation4]  }
 0x170   : > { %324 = dma.done.wait (%p277_p5), [#allocation4], 16  }
 0x171   : > { %326 = vsyncadd (%p277_p5), [#allocation4], 4294967280 }
 0x172 PF: > { %s13_s9 = sadd.s32 1, %s329_s9  }
 0x173   : > { %p10_p13 = scmp.ge.s32.totalorder %s13_s9, 5  }
 0x175   :  { %12 = sbr.rel (!%p10_p13) target bundleno = 1 (0x1), region = 62 }
 0x17a   :  { %223 = vsyncpa [#allocation4], 1 }
 0x17b   :  { %225 = vsyncpa [#allocation4 + $0x1], 1 }

</bundles_post_ra>
